<compile_context>
chip_gen: v7x
topology: tpu7x:2x2x1
jax: 0.10.0
libtpu: 0.0.40
codegen_flags: <defaults>
</compile_context>

<pallas_src>
import math
import jax
import jax.numpy as jnp
from jax import lax
from jax.experimental import pallas as pl
from jax.experimental.pallas import tpu as pltpu

N_FEATURE = 16
P_DIM = 3
IN_CHANNEL = N_FEATURE + P_DIM          # 19
HID1 = N_FEATURE                        # 16
HID2 = N_FEATURE * 2                    # 32
OUT_CHANNEL = (N_FEATURE + 6 + 1) * 2   # 46
TM_MAX = 1024                           # rows per grid step (VMEM-safe on all gens)


def decoder_kernel(xf_ref, xp_ref, w1f_ref, w1p_ref, b1_ref,
                   w2_ref, b2_ref, w3_ref, b3_ref,
                   lf_ref, lp_ref, li_ref, rf_ref, rp_ref, ri_ref):
    xf = xf_ref[...]                       # (TM, 16)
    xp = xp_ref[...]                       # (TM, 3)
    w1p = w1p_ref[...]                     # (3, 16)

    # ---- Linear 1:  [xf | xp] @ W1 + b1 ------------------------------------
    # K=16 part on the MXU; K=3 part as three VPU broadcast-FMAs (a K=3 MXU
    # pass wastes a vmatmul push + result-pop latency for ~2% utilization).
    h1 = jnp.dot(xf, w1f_ref[...], preferred_element_type=jnp.float32) + b1_ref[...]
    h1 = h1 + xp[:, 0:1] * w1p[0:1, :]
    h1 = h1 + xp[:, 1:2] * w1p[1:2, :]
    h1 = h1 + xp[:, 2:3] * w1p[2:3, :]
    h1 = jnp.maximum(h1, 0.0)                                          # ReLU

    # ---- Linear 2 / Linear 3 ------------------------------------------------
    h2 = jnp.dot(h1, w2_ref[...], preferred_element_type=jnp.float32) + b2_ref[...]
    h2 = jnp.maximum(h2, 0.0)                                          # ReLU
    out = jnp.dot(h2, w3_ref[...], preferred_element_type=jnp.float32) + b3_ref[...]

    # ---- Column-wise activation with a SINGLE EUP (tanh) pass ---------------
    #   tanh cols    : [16,18) and [39,41)
    #   sigmoid cols : [18,23) and [41,46)   via sigmoid(x) = 0.5*tanh(0.5*x)+0.5
    #   identity     : everything else
    col = lax.broadcasted_iota(jnp.int32, out.shape, 1)
    tanh_mask = (((col >= N_FEATURE) & (col < N_FEATURE + 2))
                 | ((col >= 2 * N_FEATURE + 7) & (col < 2 * N_FEATURE + 9)))
    sig_mask = (((col >= N_FEATURE + 2) & (col < N_FEATURE + 7))
                | ((col >= 2 * N_FEATURE + 9) & (col < 2 * N_FEATURE + 14)))
    t = jnp.tanh(jnp.where(sig_mask, 0.5 * out, out))      # one tanh over the tile
    act = jnp.where(tanh_mask, t, jnp.where(sig_mask, 0.5 * t + 0.5, out))

    # ---- Write the 6 module outputs directly (no wrapper-side re-slicing) ---
    nf = N_FEATURE
    lf_ref[...] = act[:, 0:nf]                       # left feature
    lp_ref[...] = act[:, nf:nf + 6]                  # left P (xy tanh, s_wha sigmoid)
    li_ref[...] = act[:, nf + 6:nf + 7]              # left isleaf
    rf_ref[...] = act[:, nf + 7:2 * nf + 7]          # right feature
    rp_ref[...] = act[:, 2 * nf + 7:2 * nf + 13]     # right P
    ri_ref[...] = act[:, 2 * nf + 13:2 * nf + 14]    # right isleaf


def _round_up(x, m):
    return ((x + m - 1) // m) * m


def decoder_forward(feature_father, p_father, params, *, tile_rows=None):
    w1, b1, w2, b2, w3, b3 = params
    n = feature_father.shape[0]

    if tile_rows is None:
        # Cap the tile at ceil(n/2) rows so there are >= 2 grid steps whenever
        # possible (lets the "parallel" axis shard across both v7x TensorCores).
        half = max(1, (n + 1) // 2)
        tm = min(TM_MAX, max(8, _round_up(half, 8)))
    else:
        tm = max(8, _round_up(tile_rows, 8))
    grid = (pl.cdiv(n, tm),)

    # Split W1 along the contraction dim (tiny one-time slices, outside the kernel).
    w1f = w1[:N_FEATURE]        # (16, 16)  -> MXU dot
    w1p = w1[N_FEATURE:]        # (3, 16)   -> VPU broadcast-FMAs

    flops = 2 * n * (IN_CHANNEL * HID1 + HID1 * HID2 + HID2 * OUT_CHANNEL)
    transcendentals = n * OUT_CHANNEL           # single tanh pass over the tile
    bytes_accessed = 4 * (n * (IN_CHANNEL + OUT_CHANNEL)
                          + IN_CHANNEL * HID1 + HID1 * HID2 + HID2 * OUT_CHANNEL
                          + HID1 + HID2 + OUT_CHANNEL)

    nf = N_FEATURE
    out_dims = (nf, 6, 1, nf, 6, 1)
    out_shapes = tuple(jax.ShapeDtypeStruct((n, d), jnp.float32) for d in out_dims)
    out_specs = tuple(pl.BlockSpec((tm, d), lambda i: (i, 0)) for d in out_dims)

    outs = pl.pallas_call(
        decoder_kernel,
        out_shape=out_shapes,
        grid_spec=pltpu.PrefetchScalarGridSpec(
            num_scalar_prefetch=0,
            grid=grid,
            in_specs=[
                pl.BlockSpec((tm, N_FEATURE), lambda i: (i, 0)),        # feature_father tile
                pl.BlockSpec((tm, P_DIM), lambda i: (i, 0)),            # p_father tile
                pl.BlockSpec((N_FEATURE, HID1), lambda i: (0, 0)),      # W1[:16]
                pl.BlockSpec((P_DIM, HID1), lambda i: (0, 0)),          # W1[16:]
                pl.BlockSpec((1, HID1), lambda i: (0, 0)),              # b1
                pl.BlockSpec((HID1, HID2), lambda i: (0, 0)),           # W2
                pl.BlockSpec((1, HID2), lambda i: (0, 0)),              # b2
                pl.BlockSpec((HID2, OUT_CHANNEL), lambda i: (0, 0)),    # W3
                pl.BlockSpec((1, OUT_CHANNEL), lambda i: (0, 0)),       # b3
            ],
            out_specs=out_specs,
        ),
        compiler_params=pltpu.CompilerParams(
            dimension_semantics=("parallel",),
            vmem_limit_bytes=32 * 1024 * 1024),
        cost_estimate=pl.CostEstimate(flops=flops,
                                      transcendentals=transcendentals,
                                      bytes_accessed=bytes_accessed),
    )(feature_father.astype(jnp.float32), p_father.astype(jnp.float32),
      w1f, w1p, b1, w2, b2, w3, b3)
    return outs


def init_params(key):
    """Deterministic xavier_uniform(gain=relu) init, matching get_and_init_FC_layer.
    Weights stored as (din, dout) so the kernel does x @ W (== torch's x @ W.T)."""
    dims = (IN_CHANNEL, HID1, HID2, OUT_CHANNEL)
    params = []
    gain = math.sqrt(2.0)  # nn.init.calculate_gain('relu')
    for din, dout in zip(dims[:-1], dims[1:]):
        key, kw = jax.random.split(key)
        bound = gain * math.sqrt(6.0 / (din + dout))
        w = jax.random.uniform(kw, (din, dout), jnp.float32, -bound, bound)
        b = jnp.zeros((1, dout), jnp.float32)  # synthetic weights; zero bias is fine for the self-test
        params.extend([w, b])
    return tuple(params)


def decoder_reference(feature_father, p_father, params):
    """Pure-JAX reference of the PyTorch forward, for correctness checking."""
    w1, b1, w2, b2, w3, b3 = params
    x = jnp.concatenate([feature_father, p_father], axis=1)
    h1 = jax.nn.relu(x @ w1 + b1)
    h2 = jax.nn.relu(h1 @ w2 + b2)
    out = h2 @ w3 + b3
    nf = N_FEATURE
    left_feature = out[:, :nf]
    left_P = jnp.concatenate(
        [jnp.tanh(out[:, nf:nf + 2]), jax.nn.sigmoid(out[:, nf + 2:nf + 6])], axis=1)
    left_isleaf = jax.nn.sigmoid(out[:, nf + 6:nf + 7])
    right_feature = out[:, nf + 7:2 * nf + 7]
    right_P = jnp.concatenate(
        [jnp.tanh(out[:, 2 * nf + 7:2 * nf + 9]),
         jax.nn.sigmoid(out[:, 2 * nf + 9:2 * nf + 13])], axis=1)
    right_isleaf = jax.nn.sigmoid(out[:, 2 * nf + 13:])
    return left_feature, left_P, left_isleaf, right_feature, right_P, right_isleaf


def _check(outs, refs, n):
    expected_shapes = [(n, 16), (n, 6), (n, 1), (n, 16), (n, 6), (n, 1)]
    ok = True
    for o, r, s in zip(outs, refs, expected_shapes):
        ok &= (o.shape == s)
        ok &= bool(jnp.allclose(o, r, atol=1e-5, rtol=1e-5))
    return ok


if __name__ == "__main__":
    key = jax.random.PRNGKey(0)
    kp, kf, kpos = jax.random.split(key, 3)
    params = init_params(kp)

    ok = True

    # Case 1: small batch, single tile.
    n = 8
    feature_father = jax.random.normal(kf, (n, N_FEATURE), jnp.float32)
    p_father = jax.random.normal(kpos, (n, P_DIM), jnp.float32)
    outs = jax.block_until_ready(decoder_forward(feature_father, p_father, params))
    refs = decoder_reference(feature_father, p_father, params)
    ok &= _check(outs, refs, n)

    # Case 2: multi-step grid with a partial last tile (exercises masked writes).
    n2 = 37
    kf2, kp2 = jax.random.split(jax.random.PRNGKey(1))
    ff2 = jax.random.normal(kf2, (n2, N_FEATURE), jnp.float32)
    pf2 = jax.random.normal(kp2, (n2, P_DIM), jnp.float32)
    outs2 = jax.block_until_ready(decoder_forward(ff2, pf2, params, tile_rows=8))
    refs2 = decoder_reference(ff2, pf2, params)
    ok &= _check(outs2, refs2, n2)

    # Case 3: default tile selection (two grid steps, partial second tile).
    n3 = 300
    kf3, kp3 = jax.random.split(jax.random.PRNGKey(2))
    ff3 = jax.random.normal(kf3, (n3, N_FEATURE), jnp.float32)
    pf3 = jax.random.normal(kp3, (n3, P_DIM), jnp.float32)
    outs3 = jax.block_until_ready(decoder_forward(ff3, pf3, params))
    refs3 = decoder_reference(ff3, pf3, params)
    ok &= _check(outs3, refs3, n3)

    if ok:
        print("KERNEL_OK")
    else:
        print("MISMATCH")
</pallas_src>

<mosaic_0001>
module attributes {stable_mosaic.version = 11 : i64} {
  func.func @decoder_kernel(%arg0: i32, %arg1: memref<8x16xf32, #tpu.memory_space<vmem>>, %arg2: memref<8x3xf32, #tpu.memory_space<vmem>>, %arg3: memref<16x16xf32, #tpu.memory_space<vmem>>, %arg4: memref<3x16xf32, #tpu.memory_space<vmem>>, %arg5: memref<1x16xf32, #tpu.memory_space<vmem>>, %arg6: memref<16x32xf32, #tpu.memory_space<vmem>>, %arg7: memref<1x32xf32, #tpu.memory_space<vmem>>, %arg8: memref<32x46xf32, #tpu.memory_space<vmem>>, %arg9: memref<1x46xf32, #tpu.memory_space<vmem>>, %arg10: memref<8x16xf32, #tpu.memory_space<vmem>>, %arg11: memref<8x6xf32, #tpu.memory_space<vmem>>, %arg12: memref<8x1xf32, #tpu.memory_space<vmem>>, %arg13: memref<8x16xf32, #tpu.memory_space<vmem>>, %arg14: memref<8x6xf32, #tpu.memory_space<vmem>>, %arg15: memref<8x1xf32, #tpu.memory_space<vmem>>) attributes {dimension_semantics = [#tpu.dimension_semantics<parallel>], iteration_bounds = array<i64: 1>, scalar_prefetch = 0 : i64, scratch_operands = 0 : i64, tpu.core_type = #tpu.core_type<tc>, window_params = [{transform_indices = @transform_0, window_bounds = array<i64: 8, 16>}, {transform_indices = @transform_1, window_bounds = array<i64: 8, 3>}, {pipeline_mode = #tpu.pipeline_mode<synchronous>, transform_indices = @transform_2, window_bounds = array<i64: 16, 16>}, {pipeline_mode = #tpu.pipeline_mode<synchronous>, transform_indices = @transform_3, window_bounds = array<i64: 3, 16>}, {pipeline_mode = #tpu.pipeline_mode<synchronous>, transform_indices = @transform_4, window_bounds = array<i64: 1, 16>}, {pipeline_mode = #tpu.pipeline_mode<synchronous>, transform_indices = @transform_5, window_bounds = array<i64: 16, 32>}, {pipeline_mode = #tpu.pipeline_mode<synchronous>, transform_indices = @transform_6, window_bounds = array<i64: 1, 32>}, {pipeline_mode = #tpu.pipeline_mode<synchronous>, transform_indices = @transform_7, window_bounds = array<i64: 32, 46>}, {pipeline_mode = #tpu.pipeline_mode<synchronous>, transform_indices = @transform_8, window_bounds = array<i64: 1, 46>}, {transform_indices = @transform_9, window_bounds = array<i64: 8, 16>}, {transform_indices = @transform_10, window_bounds = array<i64: 8, 6>}, {transform_indices = @transform_11, window_bounds = array<i64: 8, 1>}, {transform_indices = @transform_12, window_bounds = array<i64: 8, 16>}, {transform_indices = @transform_13, window_bounds = array<i64: 8, 6>}, {transform_indices = @transform_14, window_bounds = array<i64: 8, 1>}]} {
    %c0 = arith.constant 0 : index
    %c0_0 = arith.constant 0 : index
    %0 = vector.load %arg1[%c0, %c0_0] : memref<8x16xf32, #tpu.memory_space<vmem>>, vector<8x16xf32>
    %c0_1 = arith.constant 0 : index
    %c0_2 = arith.constant 0 : index
    %1 = vector.load %arg2[%c0_1, %c0_2] : memref<8x3xf32, #tpu.memory_space<vmem>>, vector<8x3xf32>
    %c0_3 = arith.constant 0 : index
    %c0_4 = arith.constant 0 : index
    %2 = vector.load %arg4[%c0_3, %c0_4] : memref<3x16xf32, #tpu.memory_space<vmem>>, vector<3x16xf32>
    %c0_5 = arith.constant 0 : index
    %c0_6 = arith.constant 0 : index
    %3 = vector.load %arg3[%c0_5, %c0_6] : memref<16x16xf32, #tpu.memory_space<vmem>>, vector<16x16xf32>
    %cst = arith.constant dense<0.000000e+00> : vector<8x16xf32>
    %4 = tpu.matmul %0, %3, %cst {dimension_numbers = #tpu.dot_dimension_numbers<[1], [0], [0], [1], [0, 0, 1, 1], [], []>} : vector<8x16xf32>, vector<16x16xf32>, vector<8x16xf32> -> vector<8x16xf32>
    %c0_7 = arith.constant 0 : index
    %c0_8 = arith.constant 0 : index
    %5 = vector.load %arg5[%c0_7, %c0_8] : memref<1x16xf32, #tpu.memory_space<vmem>>, vector<1x16xf32>
    %6 = vector.broadcast %5 : vector<1x16xf32> to vector<8x16xf32>
    %7 = arith.addf %4, %6 : vector<8x16xf32>
    %8 = vector.extract_strided_slice %1 {offsets = [0, 0], sizes = [8, 1], strides = [1, 1]} : vector<8x3xf32> to vector<8x1xf32>
    %9 = vector.extract_strided_slice %2 {offsets = [0, 0], sizes = [1, 16], strides = [1, 1]} : vector<3x16xf32> to vector<1x16xf32>
    %10 = vector.broadcast %8 : vector<8x1xf32> to vector<8x16xf32>
    %11 = vector.broadcast %9 : vector<1x16xf32> to vector<8x16xf32>
    %12 = arith.mulf %10, %11 : vector<8x16xf32>
    %13 = arith.addf %7, %12 : vector<8x16xf32>
    %14 = vector.extract_strided_slice %1 {offsets = [0, 1], sizes = [8, 1], strides = [1, 1]} : vector<8x3xf32> to vector<8x1xf32>
    %15 = vector.extract_strided_slice %2 {offsets = [1, 0], sizes = [1, 16], strides = [1, 1]} : vector<3x16xf32> to vector<1x16xf32>
    %16 = vector.broadcast %14 : vector<8x1xf32> to vector<8x16xf32>
    %17 = vector.broadcast %15 : vector<1x16xf32> to vector<8x16xf32>
    %18 = arith.mulf %16, %17 : vector<8x16xf32>
    %19 = arith.addf %13, %18 : vector<8x16xf32>
    %20 = vector.extract_strided_slice %1 {offsets = [0, 2], sizes = [8, 1], strides = [1, 1]} : vector<8x3xf32> to vector<8x1xf32>
    %21 = vector.extract_strided_slice %2 {offsets = [2, 0], sizes = [1, 16], strides = [1, 1]} : vector<3x16xf32> to vector<1x16xf32>
    %22 = vector.broadcast %20 : vector<8x1xf32> to vector<8x16xf32>
    %23 = vector.broadcast %21 : vector<1x16xf32> to vector<8x16xf32>
    %24 = arith.mulf %22, %23 : vector<8x16xf32>
    %25 = arith.addf %19, %24 : vector<8x16xf32>
    %cst_9 = arith.constant 0.000000e+00 : f32
    %26 = vector.broadcast %cst_9 : f32 to vector<8x16xf32>
    %27 = arith.maximumf %25, %26 : vector<8x16xf32>
    %c0_10 = arith.constant 0 : index
    %c0_11 = arith.constant 0 : index
    %28 = vector.load %arg6[%c0_10, %c0_11] : memref<16x32xf32, #tpu.memory_space<vmem>>, vector<16x32xf32>
    %cst_12 = arith.constant dense<0.000000e+00> : vector<8x32xf32>
    %29 = tpu.matmul %27, %28, %cst_12 {dimension_numbers = #tpu.dot_dimension_numbers<[1], [0], [0], [1], [0, 0, 1, 1], [], []>} : vector<8x16xf32>, vector<16x32xf32>, vector<8x32xf32> -> vector<8x32xf32>
    %c0_13 = arith.constant 0 : index
    %c0_14 = arith.constant 0 : index
    %30 = vector.load %arg7[%c0_13, %c0_14] : memref<1x32xf32, #tpu.memory_space<vmem>>, vector<1x32xf32>
    %31 = vector.broadcast %30 : vector<1x32xf32> to vector<8x32xf32>
    %32 = arith.addf %29, %31 : vector<8x32xf32>
    %cst_15 = arith.constant 0.000000e+00 : f32
    %33 = vector.broadcast %cst_15 : f32 to vector<8x32xf32>
    %34 = arith.maximumf %32, %33 : vector<8x32xf32>
    %c0_16 = arith.constant 0 : index
    %c0_17 = arith.constant 0 : index
    %35 = vector.load %arg8[%c0_16, %c0_17] : memref<32x46xf32, #tpu.memory_space<vmem>>, vector<32x46xf32>
    %cst_18 = arith.constant dense<0.000000e+00> : vector<8x46xf32>
    %36 = tpu.matmul %34, %35, %cst_18 {dimension_numbers = #tpu.dot_dimension_numbers<[1], [0], [0], [1], [0, 0, 1, 1], [], []>} : vector<8x32xf32>, vector<32x46xf32>, vector<8x46xf32> -> vector<8x46xf32>
    %c0_19 = arith.constant 0 : index
    %c0_20 = arith.constant 0 : index
    %37 = vector.load %arg9[%c0_19, %c0_20] : memref<1x46xf32, #tpu.memory_space<vmem>>, vector<1x46xf32>
    %38 = vector.broadcast %37 : vector<1x46xf32> to vector<8x46xf32>
    %39 = arith.addf %36, %38 : vector<8x46xf32>
    %40 = tpu.iota {dimensions = array<i32: 1>} : vector<8x46xi32>
    %c16_i32 = arith.constant 16 : i32
    %41 = vector.broadcast %c16_i32 : i32 to vector<8x46xi32>
    %42 = arith.cmpi sge, %40, %41 : vector<8x46xi32>
    %c18_i32 = arith.constant 18 : i32
    %43 = vector.broadcast %c18_i32 : i32 to vector<8x46xi32>
    %44 = arith.cmpi slt, %40, %43 : vector<8x46xi32>
    %45 = arith.andi %42, %44 : vector<8x46xi1>
    %c39_i32 = arith.constant 39 : i32
    %46 = vector.broadcast %c39_i32 : i32 to vector<8x46xi32>
    %47 = arith.cmpi sge, %40, %46 : vector<8x46xi32>
    %c41_i32 = arith.constant 41 : i32
    %48 = vector.broadcast %c41_i32 : i32 to vector<8x46xi32>
    %49 = arith.cmpi slt, %40, %48 : vector<8x46xi32>
    %50 = arith.andi %47, %49 : vector<8x46xi1>
    %51 = arith.ori %45, %50 : vector<8x46xi1>
    %c18_i32_21 = arith.constant 18 : i32
    %52 = vector.broadcast %c18_i32_21 : i32 to vector<8x46xi32>
    %53 = arith.cmpi sge, %40, %52 : vector<8x46xi32>
    %c23_i32 = arith.constant 23 : i32
    %54 = vector.broadcast %c23_i32 : i32 to vector<8x46xi32>
    %55 = arith.cmpi slt, %40, %54 : vector<8x46xi32>
    %56 = arith.andi %53, %55 : vector<8x46xi1>
    %c41_i32_22 = arith.constant 41 : i32
    %57 = vector.broadcast %c41_i32_22 : i32 to vector<8x46xi32>
    %58 = arith.cmpi sge, %40, %57 : vector<8x46xi32>
    %c46_i32 = arith.constant 46 : i32
    %59 = vector.broadcast %c46_i32 : i32 to vector<8x46xi32>
    %60 = arith.cmpi slt, %40, %59 : vector<8x46xi32>
    %61 = arith.andi %58, %60 : vector<8x46xi1>
    %62 = arith.ori %56, %61 : vector<8x46xi1>
    %cst_23 = arith.constant 5.000000e-01 : f32
    %63 = vector.broadcast %cst_23 : f32 to vector<8x46xf32>
    %64 = arith.mulf %63, %39 : vector<8x46xf32>
    %65 = arith.select %62, %64, %39 : vector<8x46xi1>, vector<8x46xf32>
    %66 = math.tanh %65 : vector<8x46xf32>
    %cst_24 = arith.constant 5.000000e-01 : f32
    %67 = vector.broadcast %cst_24 : f32 to vector<8x46xf32>
    %68 = arith.mulf %67, %66 : vector<8x46xf32>
    %cst_25 = arith.constant 5.000000e-01 : f32
    %69 = vector.broadcast %cst_25 : f32 to vector<8x46xf32>
    %70 = arith.addf %68, %69 : vector<8x46xf32>
    %71 = arith.select %62, %70, %39 : vector<8x46xi1>, vector<8x46xf32>
    %72 = arith.select %51, %66, %71 : vector<8x46xi1>, vector<8x46xf32>
    %73 = vector.extract_strided_slice %72 {offsets = [0, 0], sizes = [8, 16], strides = [1, 1]} : vector<8x46xf32> to vector<8x16xf32>
    %c0_26 = arith.constant 0 : index
    %c0_27 = arith.constant 0 : index
    %74 = vector.load %arg10[%c0_26, %c0_27] : memref<8x16xf32, #tpu.memory_space<vmem>>, vector<8x16xf32>
    tpu.vector_store %arg10[%c0_26, %c0_27], %73 {strides = array<i32>} : memref<8x16xf32, #tpu.memory_space<vmem>>, vector<8x16xf32>,
    %75 = vector.extract_strided_slice %72 {offsets = [0, 16], sizes = [8, 6], strides = [1, 1]} : vector<8x46xf32> to vector<8x6xf32>
    %c0_28 = arith.constant 0 : index
    %c0_29 = arith.constant 0 : index
    %76 = vector.load %arg11[%c0_28, %c0_29] : memref<8x6xf32, #tpu.memory_space<vmem>>, vector<8x6xf32>
    tpu.vector_store %arg11[%c0_28, %c0_29], %75 {strides = array<i32>} : memref<8x6xf32, #tpu.memory_space<vmem>>, vector<8x6xf32>,
    %77 = vector.extract_strided_slice %72 {offsets = [0, 22], sizes = [8, 1], strides = [1, 1]} : vector<8x46xf32> to vector<8x1xf32>
    %c0_30 = arith.constant 0 : index
    %c0_31 = arith.constant 0 : index
    %78 = vector.load %arg12[%c0_30, %c0_31] : memref<8x1xf32, #tpu.memory_space<vmem>>, vector<8x1xf32>
    tpu.vector_store %arg12[%c0_30, %c0_31], %77 {strides = array<i32>} : memref<8x1xf32, #tpu.memory_space<vmem>>, vector<8x1xf32>,
    %79 = vector.extract_strided_slice %72 {offsets = [0, 23], sizes = [8, 16], strides = [1, 1]} : vector<8x46xf32> to vector<8x16xf32>
    %c0_32 = arith.constant 0 : index
    %c0_33 = arith.constant 0 : index
    %80 = vector.load %arg13[%c0_32, %c0_33] : memref<8x16xf32, #tpu.memory_space<vmem>>, vector<8x16xf32>
    tpu.vector_store %arg13[%c0_32, %c0_33], %79 {strides = array<i32>} : memref<8x16xf32, #tpu.memory_space<vmem>>, vector<8x16xf32>,
    %81 = vector.extract_strided_slice %72 {offsets = [0, 39], sizes = [8, 6], strides = [1, 1]} : vector<8x46xf32> to vector<8x6xf32>
    %c0_34 = arith.constant 0 : index
    %c0_35 = arith.constant 0 : index
    %82 = vector.load %arg14[%c0_34, %c0_35] : memref<8x6xf32, #tpu.memory_space<vmem>>, vector<8x6xf32>
    tpu.vector_store %arg14[%c0_34, %c0_35], %81 {strides = array<i32>} : memref<8x6xf32, #tpu.memory_space<vmem>>, vector<8x6xf32>,
    %83 = vector.extract_strided_slice %72 {offsets = [0, 45], sizes = [8, 1], strides = [1, 1]} : vector<8x46xf32> to vector<8x1xf32>
    %c0_36 = arith.constant 0 : index
    %c0_37 = arith.constant 0 : index
    %84 = vector.load %arg15[%c0_36, %c0_37] : memref<8x1xf32, #tpu.memory_space<vmem>>, vector<8x1xf32>
    tpu.vector_store %arg15[%c0_36, %c0_37], %83 {strides = array<i32>} : memref<8x1xf32, #tpu.memory_space<vmem>>, vector<8x1xf32>,
    return
  }
  func.func @transform_0(%arg0: i32) -> (i32, i32) {
    %c0_i32 = arith.constant 0 : i32
    %c0_i32_0 = arith.constant 0 : i32
    return %arg0, %c0_i32 : i32, i32
  }
  func.func @transform_1(%arg0: i32) -> (i32, i32) {
    %c0_i32 = arith.constant 0 : i32
    %c0_i32_0 = arith.constant 0 : i32
    return %arg0, %c0_i32 : i32, i32
  }
  func.func @transform_2(%arg0: i32) -> (i32, i32) {
    %c0_i32 = arith.constant 0 : i32
    %c0_i32_0 = arith.constant 0 : i32
    %c0_i32_1 = arith.constant 0 : i32
    return %c0_i32, %c0_i32_0 : i32, i32
  }
  func.func @transform_3(%arg0: i32) -> (i32, i32) {
    %c0_i32 = arith.constant 0 : i32
    %c0_i32_0 = arith.constant 0 : i32
    %c0_i32_1 = arith.constant 0 : i32
    return %c0_i32, %c0_i32_0 : i32, i32
  }
  func.func @transform_4(%arg0: i32) -> (i32, i32) {
    %c0_i32 = arith.constant 0 : i32
    %c0_i32_0 = arith.constant 0 : i32
    %c0_i32_1 = arith.constant 0 : i32
    return %c0_i32, %c0_i32_0 : i32, i32
  }
  func.func @transform_5(%arg0: i32) -> (i32, i32) {
    %c0_i32 = arith.constant 0 : i32
    %c0_i32_0 = arith.constant 0 : i32
    %c0_i32_1 = arith.constant 0 : i32
    return %c0_i32, %c0_i32_0 : i32, i32
  }
  func.func @transform_6(%arg0: i32) -> (i32, i32) {
    %c0_i32 = arith.constant 0 : i32
    %c0_i32_0 = arith.constant 0 : i32
    %c0_i32_1 = arith.constant 0 : i32
    return %c0_i32, %c0_i32_0 : i32, i32
  }
  func.func @transform_7(%arg0: i32) -> (i32, i32) {
    %c0_i32 = arith.constant 0 : i32
    %c0_i32_0 = arith.constant 0 : i32
    %c0_i32_1 = arith.constant 0 : i32
    return %c0_i32, %c0_i32_0 : i32, i32
  }
  func.func @transform_8(%arg0: i32) -> (i32, i32) {
    %c0_i32 = arith.constant 0 : i32
    %c0_i32_0 = arith.constant 0 : i32
    %c0_i32_1 = arith.constant 0 : i32
    return %c0_i32, %c0_i32_0 : i32, i32
  }
  func.func @transform_9(%arg0: i32) -> (i32, i32) {
    %c0_i32 = arith.constant 0 : i32
    %c0_i32_0 = arith.constant 0 : i32
    return %arg0, %c0_i32 : i32, i32
  }
  func.func @transform_10(%arg0: i32) -> (i32, i32) {
    %c0_i32 = arith.constant 0 : i32
    %c0_i32_0 = arith.constant 0 : i32
    return %arg0, %c0_i32 : i32, i32
  }
  func.func @transform_11(%arg0: i32) -> (i32, i32) {
    %c0_i32 = arith.constant 0 : i32
    %c0_i32_0 = arith.constant 0 : i32
    return %arg0, %c0_i32 : i32, i32
  }
  func.func @transform_12(%arg0: i32) -> (i32, i32) {
    %c0_i32 = arith.constant 0 : i32
    %c0_i32_0 = arith.constant 0 : i32
    return %arg0, %c0_i32 : i32, i32
  }
  func.func @transform_13(%arg0: i32) -> (i32, i32) {
    %c0_i32 = arith.constant 0 : i32
    %c0_i32_0 = arith.constant 0 : i32
    return %arg0, %c0_i32 : i32, i32
  }
  func.func @transform_14(%arg0: i32) -> (i32, i32) {
    %c0_i32 = arith.constant 0 : i32
    %c0_i32_0 = arith.constant 0 : i32
    return %arg0, %c0_i32 : i32, i32
  }
}

</mosaic_0001>

<bundles_post_ra>
// kernel: tpu_custom_call.1
= control target key start
LH: loop header
LB: loop body
LE: loop exit
PB: predicated region body
PF: predicated region fallthrough
CT: control target
= control target key end

     0   :  { %20 = vsyncpa [#allocation3], 0  ;;  %s985_s0 = inlined_call_operand.hbm [shape: f32[8,16], index: 0, kind: input, shape index: {}]   ;;  %s986_s1 = inlined_call_operand.vmem [shape: f32[8,3], index: 1, kind: input, shape index: {}]   ;;  %s987_s2 = inlined_call_operand.hbm [shape: f32[16,16], index: 2, kind: input, shape index: {}]   ;;  %s988_s3 = inlined_call_operand.vmem [shape: f32[3,16], index: 3, kind: input, shape index: {}]   ;;  %s989_s4 = inlined_call_operand.vmem [shape: f32[1,16], index: 4, kind: input, shape index: {}]   ;;  %s990_s5 = inlined_call_operand.hbm [shape: f32[16,32], index: 5, kind: input, shape index: {}]   ;;  %s991_s6 = inlined_call_operand.vmem [shape: f32[1,32], index: 6, kind: input, shape index: {}]   ;;  %s992_s7 = inlined_call_operand.vmem [shape: f32[32,46], index: 7, kind: input, shape index: {}]   ;;  %s993_s8 = inlined_call_operand.vmem [shape: f32[1,46], index: 8, kind: input, shape index: {}]   ;;  %s994_s9 = inlined_call_operand.hbm [shape: f32[8,16], index: 9, kind: output, shape index: {0}]   ;;  %s995_s10 = inlined_call_operand.hbm [shape: f32[8,6], index: 10, kind: output, shape index: {1}]   ;;  %s996_s11 = inlined_call_operand.vmem [shape: f32[8,1], index: 11, kind: output, shape index: {2}]   ;;  %s997_s12 = inlined_call_operand.hbm [shape: f32[8,16], index: 12, kind: output, shape index: {3}]   ;;  %s998_s13 = inlined_call_operand.hbm [shape: f32[8,6], index: 13, kind: output, shape index: {4}]   ;;  %s999_s14 = inlined_call_operand.vmem [shape: f32[8,1], index: 14, kind: output, shape index: {5}]  }
   0x1   :  { %21 = vsyncpa [#allocation6], 0 }
   0x2   :  { %22 = vsyncpa [#allocation4], 0 }
   0x3   :  { %23 = vsyncpa [#allocation10], 0 }
   0x4   :  { %24 = vsyncpa [#allocation13], 0  ;;  %s722_s29 = smov [#allocation5]   ;;  %s558_s17 = scalar_lea.hbm %s987_s2, 256 }
   0x5   :  { %s42_s30 = sshll.u32 %s722_s29, 4  ;;  %p559_p0 = scmp.ne.s32.totalorder %s987_s2, %s558_s17  ;;  %s43_s30 = int_to_ptr.vmem [resolvable:$true] %s42_s30 }
   0x6   :  { %p562_p1 = scmp.lt.u32.totalorder %s558_s17, %s987_s2 }
   0x8   :  { %p564_p2 = pnand %p562_p1, %p559_p0 }
   0xa   :  { %567 = shalt.err (!%p564_p2)
}
   0xb   :  { %s568_s22 = scalar_lea.vmem %s43_s30, 256  ;;  %p573_p4 = scmp.lt.s32.totalorder %s43_s30, %s43_s30 }
   0xc   :  { %p569_p3 = scmp.ne.s32.totalorder %s43_s30, %s568_s22  ;;  %p574_p5 = scmp.lt.s32.totalorder %s568_s22, %s568_s22 }
   0xe   :  { %p575_p6 = por %p574_p5, %p573_p4 }
  0x10   :  { %p576_p7 = pnand %p575_p6, %p569_p3 }
  0x12   :  { %579 = shalt.err (!%p576_p7)
}
  0x13   :  { %s723_s23 = smov 128   ;;  %s724_s24 = smov 8  }
  0x14   :  { %48 = dma.hbm_to_vmem [thread:$0]  %s987_s2, 256, %s43_s30, [#allocation6], %s723_s23, %s723_s23, %s724_s24  }
  0x15   :  { %s725_s27 = smov [#allocation2]   ;;  %s726_s29 = smov [#allocation7]  }
  0x16   :  { %s31_s28 = sshll.u32 %s725_s27, 4  ;;  %s58_s15 = sshll.u32 %s726_s29, 4  ;;  %s32_s28 = int_to_ptr.vmem [resolvable:$true] %s31_s28  ;;  %s59_s15 = int_to_ptr.vmem [resolvable:$true] %s58_s15 }
  0x17   :  { %s580_s18 = scalar_lea.hbm %s985_s0, 128 }
  0x18   :  { %p581_p8 = scmp.ne.s32.totalorder %s985_s0, %s580_s18  ;;  %p584_p9 = scmp.lt.u32.totalorder %s580_s18, %s985_s0 }
  0x1a   :  { %p586_p10 = pnand %p584_p9, %p581_p8 }
  0x1c   :  { %589 = shalt.err (!%p586_p10)
}
  0x1d   :  { %s590_s2 = scalar_lea.vmem %s32_s28, 128  ;;  %p595_p12 = scmp.lt.s32.totalorder %s32_s28, %s32_s28 }
  0x1e   :  { %p591_p11 = scmp.ne.s32.totalorder %s32_s28, %s590_s2  ;;  %p596_p13 = scmp.lt.s32.totalorder %s590_s2, %s590_s2 }
  0x20   :  { %p597_p0 = por %p596_p13, %p595_p12 }
  0x22   :  { %p598_p1 = pnand %p597_p0, %p591_p11 }
  0x24   :  { %601 = shalt.err (!%p598_p1)
}
  0x25   :  { %34 = dma.hbm_to_vmem [thread:$0]  %s985_s0, 128, %s32_s28, [#allocation3]  }
  0x26   :  { %s602_s29 = scalar_lea.hbm %s990_s5, 256 }
  0x27   :  { %p603_p2 = scmp.ne.s32.totalorder %s990_s5, %s602_s29  ;;  %p606_p3 = scmp.lt.u32.totalorder %s602_s29, %s990_s5 }
  0x29   :  { %p608_p4 = pnand %p606_p3, %p603_p2 }
  0x2b   :  { %611 = shalt.err (!%p608_p4)
}
  0x2c   :  { %s612_s20 = scalar_lea.vmem %s59_s15, 256  ;;  %p617_p6 = scmp.lt.s32.totalorder %s59_s15, %s59_s15 }
  0x2d   :  { %p613_p5 = scmp.ne.s32.totalorder %s59_s15, %s612_s20  ;;  %p618_p7 = scmp.lt.s32.totalorder %s612_s20, %s612_s20 }
  0x2f   :  { %p619_p8 = por %p618_p7, %p617_p6 }
  0x31   :  { %p620_p9 = pnand %p619_p8, %p613_p5 }
  0x33   :  { %623 = shalt.err (!%p620_p9)
}
  0x34   :  { %64 = dma.hbm_to_vmem [thread:$0]  %s990_s5, 256, %s59_s15, [#allocation6], %s723_s23, %s723_s23, %s724_s24  }
  0x35   :  { %712 = dma.done.wait [#allocation3], 128  }
  0x36   :  { %713 = vsyncadd [#allocation3], 4294967168 }
  0x37   :  { %714 = dma.done.wait [#allocation6], 512  }
  0x38   :  { %715 = vsyncadd [#allocation6], 4294966784  ;;  %v727_v0 = vmov 0.0|0.0   ;;  %vm728_vm0 = vmmov 0   ;;  %v729_v1 = vmov 0.0   ;;  %v730_v2 = vmov 0  }
  0x39   :  { %520 = vmatprep.subr.bf16.mxu1 %v727_v0  ;;  %499 = vmatprep.mubr.msk.f32.mxu1 %vm728_vm0, %v729_v1  ;;  %v731_v3 = vmov 2   ;;  %v83_v4 = vld [vmem:[#allocation5] sm:$0xff]  ;;  %v84_v5 = vld [vmem:[#allocation5 + $0x8] sm:$0xff]  ;;  %v81_v7 = vld [vmem:[%s986_s1] sm:$0xff]  ;;  %vm92_vm1 = vcmask 130048   ;;  %v732_v9 = vmov 1   ;;  %v171_v16 = vlaneseq }
  0x3a   :  { %552 = vset.pattern.permute.xlu0 %v730_v2  ;;  %554 = vset.pattern.permute.xlu1 %v731_v3  ;;  %v521_v6 = vpack.c.bf16 %v84_v5, %v83_v4  ;;  %v80_v8 = vld [vmem:[#allocation2] sm:$0xff]  ;;  %v198_v10 = vld [vmem:[#allocation7] sm:$0xff]  ;;  %v282_v14 = vld [vmem:[%s992_s7 + $0x8] sm:$0xff]  ;;  %vm292_vm2 = vcmask 261120   ;;  %s735_s19 = smov 112  }
  0x3b   :  { %526 = vmatprep.subr.bf16.mxu0 %v727_v0  ;;  %517 = vmatprep.mubr.msk.f32.mxu0 %vm728_vm0, %v729_v1  ;;  %v199_v11 = vld [vmem:[#allocation7 + $0x8] sm:$0xff]  ;;  %v172_v17 = vshrl.u32 %v171_v16, 7  ;;  %v283_v39 = vld [vmem:[%s992_s7 + $0x10] sm:$0xff]  ;;  %v284_v40 = vld [vmem:[%s992_s7 + $0x18] sm:$0xff]  ;;  %v367_v47 = vand.u32 127, %v171_v16 }
  0x3c   :  { %168 = vperm.xlu0 %552, %v81_v7   ;;  %188 = vperm.xlu1 %554, %v81_v7   ;;  %v524_v12 = vpack.c.bf16 %v199_v11, %v198_v10  ;;  %v281_v13 = vld [vmem:[%s992_s7] sm:$0xff]  ;;  %v530_v41 = vpack.c.bf16 %v284_v40, %v283_v39 }
  0x3d   :  { %522 = vmatpush3.bf16.msra.mxu1 %v521_v6  ;;  %v527_v15 = vpack.c.bf16 %v282_v14, %v281_v13  ;;  %v173_v19 = vsub.s32 0, %v172_v17  ;;  %v183_v20 = vsub.s32 1, %v172_v17  ;;  %v82_v21 = vld [vmem:[%s988_s3] sm:$0x7]  ;;  %v193_v22 = vsub.s32 2, %v172_v17 }
  0x3e   :  { %523 = vmatprep.subr.bf16.mxu1 %v727_v0  ;;  %v478_v25 = vld [vmem:[%s989_s4] ss:$0 sm:$0xff]  ;;  %vm375_vm3 = vcmp.ge.s32.totalorder %v367_v47, 18  ;;  %vm376_vm4 = vcmp.lt.s32.totalorder %v367_v47, 23  ;;  %vm378_vm5 = vcmp.ge.s32.totalorder %v367_v47, 41  ;;  %vm379_vm6 = vcmp.lt.s32.totalorder %v367_v47, 46 }
  0x3f   :  { %528 = vmatpush3.bf16.msra.mxu0 %v527_v15  ;;  %v174_v23 = vrot.slane %v82_v21, %v173_v19  ;;  %v184_v24 = vrot.slane %v82_v21, %v183_v20  ;;  %v194_v27 = vrot.slane %v82_v21, %v193_v22  ;;  %v480_v42 = vld [vmem:[%s991_s6] ss:$0 sm:$0xff]  ;;  %vm891_vm7 = vmand %vm375_vm3, %vm376_vm4  ;;  %vm368_vm10 = vcmp.ge.s32.totalorder %v367_v47, 16  ;;  %s733_s6 = smov [#allocation8]  }
  0x40   :  { %500 = vmatmul.mubr.msk.f32.vlgmr.msra.gmra.mrb[0].mxu1 %vm92_vm1, %v80_v8  ;;  %553 = vset.pattern.permute.xlu0 %v732_v9  ;;  %v482_v48 = vld [vmem:[%s993_s8] ss:$0 sm:$0xff]  ;;  %vm895_vm8 = vmand %vm378_vm5, %vm379_vm6  ;;  %vm369_vm11 = vcmp.lt.s32.totalorder %v367_v47, 18  ;;  %vm371_vm12 = vcmp.ge.s32.totalorder %v367_v47, 39  ;;  %vm372_vm13 = vcmp.lt.s32.totalorder %v367_v47, 41  ;;  %s419_s7 = sshll.u32 %s733_s6, 4  ;;  %s420_s7 = int_to_ptr.vmem [resolvable:$true] %s419_s7 }
  0x41   :  { %178 = vperm.xlu0 %553, %v81_v7   ;;  %506 = vmatprep.mubr.msk.f32.mxu1 %vm728_vm0, %v729_v1  ;;  %vm381_vm9 = vmor %vm891_vm7, %vm895_vm8  ;;  %s734_s8 = smov 89   ;;  %s624_s20 = scalar_lea.vmem %s420_s7, 128 }
  0x42   :  { %525 = vmatpush3.bf16.msra.mxu1 %v524_v12  ;;  %529 = vmatprep.subr.bf16.mxu0 %v727_v0  ;;  %vm370_vm14 = vmand %vm368_vm10, %vm369_vm11  ;;  %p625_p10 = scmp.ne.s32.totalorder %s420_s7, %s624_s20  ;;  %p629_p11 = scmp.lt.s32.totalorder %s420_s7, %s420_s7 }
  0x43   :  { %531 = vmatpush3.bf16.msra.mxu0 %v530_v41  ;;  %vm373_vm15 = vmand %vm371_vm12, %vm372_vm13  ;;  %p630_p12 = scmp.lt.s32.totalorder %s624_s20, %s624_s20 }
  0x44   :  { %vm374_vm0 = vmor %vm370_vm14, %vm373_vm15 }
  0x45   :  { %555 = vset.pattern.permute.xlu0 %v731_v3  ;;  %p631_p13 = por %p630_p12, %p629_p11 }
  0x47   :  { %p632_p0 = pnand %p631_p13, %p625_p10 }
  0xbb   :  { %v169_v18 = vpop.permute.xlu0 %168  ;;  %v189_v29 = vpop.permute.xlu1 %188 }
  0xbc   :  { %v175_v30 = vmul.f32 %v174_v23, %v169_v18  ;;  %v195_v35 = vmul.f32 %v194_v27, %v189_v29 }
  0xc0   :  { %v179_v26 = vpop.permute.xlu0 %178 }
  0xc1   :  { %v185_v33 = vmul.f32 %v184_v24, %v179_v26 }
 0x113   :  { %v162_v28 = vpop.f32.mrb[0].mxu1 }
 0x114   :  { %v163_v31 = vadd.f32 %v478_v25, %v162_v28  ;;  %v501_v32 = vpop.f32.mrb[1].mxu1 }
 0x116   :  { %v176_v34 = vadd.f32 %v175_v30, %v163_v31 }
 0x118   :  { %v186_v36 = vadd.f32 %v185_v33, %v176_v34 }
 0x11a   :  { %v196_v37 = vadd.f32 %v195_v35, %v186_v36 }
 0x11c   :  { %v197_v38 = vmax.f32 %v196_v37, 0.0 }
 0x11e   :  { %507 = vmatmul.mubr.msk.f32.vlgmr.msra.gmra.mrb[2].mxu1 %vm92_vm1, %v197_v38 }
 0x1f1   :  { %v276_v43 = vpop.f32.mrb[2].mxu1 }
 0x1f2   :  { %v277_v44 = vadd.f32 %v480_v42, %v276_v43  ;;  %v508_v45 = vpop.f32.mrb[3].mxu1 }
 0x1f4   :  { %v280_v46 = vmax.f32 %v277_v44, 0.0 }
 0x1f6   :  { %518 = vmatmul.mubr.msk.f32.vlgmr.msra.gmra.mrb[0].mxu0 %vm292_vm2, %v280_v46 }
 0x2c9   :  { %v362_v51 = vpop.f32.mrb[0].mxu0 }
 0x2ca   :  { %v363_v52 = vadd.f32 %v482_v48, %v362_v51  ;;  %v519_v53 = vpop.f32.mrb[1].mxu0 }
 0x2cc   :  { %v382_v54 = vmul.f32 0.5, %v363_v52 }
 0x2ce   :  { %v383_v55 = vsel %vm381_vm9, %v382_v54, %v363_v52 }
 0x2cf   :  { %556 = vtanh.f32 %v383_v55 }
 0x2d9   :  { %v557_v56 = vpop.eup %556 }
 0x2da   :  { %v385_v57 = vmul.f32 0.5, %v557_v56 }
 0x2dc   :  { %v386_v58 = vadd.f32 0.5, %v385_v57 }
 0x2de   :  { %v387_v59 = vsel %vm381_vm9, %v386_v58, %v363_v52 }
 0x2df   :  { %v388_v60 = vsel %vm374_vm0, %v557_v56, %v387_v59 }
 0x2e0   :  { %389 = vst.msk [vmem:[#allocation8] sm:$0xff] %vm92_vm1, %v388_v60  ;;  %405 = vrot.lane.b32.xlu0 %v388_v60, %s734_s8  ;;  %391 = vrot.lane.b32.xlu1 %v388_v60, %s735_s19 }
 0x2e1   :  { %635 = shalt.err (!%p632_p0)
}
 0x2e2   :  { %s636_s5 = scalar_lea.hbm %s994_s9, 128 }
 0x2e3   :  { %p637_p1 = scmp.ne.s32.totalorder %s994_s9, %s636_s5  ;;  %p640_p2 = scmp.lt.u32.totalorder %s636_s5, %s994_s9 }
 0x2e5   :  { %p642_p3 = pnand %p640_p2, %p637_p1 }
 0x2e7   :  { %645 = shalt.err (!%p642_p3)
}
 0x2e8   :  { %422 = dma.vmem_to_hbm [thread:$0]  %s420_s7, 128, %s994_s9, [#allocation4]   ;;  %vm394_vm2 = vcmask 48128   ;;  %vm399_vm3 = vcmask 7168  }
 0x2e9   :  { %s736_s2 = smov 83   ;;  %s737_s30 = smov 105  }
 0x2ea   :  { %409 = vrot.lane.b32.xlu0 %v388_v60, %s736_s2  ;;  %401 = vrot.lane.b32.xlu1 %v388_v60, %s737_s30  ;;  %s738_s25 = smov 106   ;;  %s739_s3 = smov [#allocation9]  }
 0x2eb   :  { %s429_s26 = sshll.u32 %s739_s3, 4  ;;  %s740_s4 = smov [#allocation12]   ;;  %s430_s26 = int_to_ptr.vmem [resolvable:$true] %s429_s26 }
 0x2ec   :  { %s451_s27 = sshll.u32 %s740_s4, 4  ;;  %s741_s29 = smov [#allocation11]   ;;  %s926_s27 = int_to_ptr.vmem [resolvable:$true] %s451_s27 }
 0x2ed   :  { %s441_s16 = sshll.u32 %s741_s29, 4  ;;  %s646_s9 = scalar_lea.vmem %s430_s26, 128  ;;  %s928_s16 = int_to_ptr.vmem [resolvable:$true] %s441_s16 }
 0x2ee   :  { %396 = vrot.lane.b32.xlu1 %v388_v60, %s738_s25  ;;  %p647_p4 = scmp.ne.s32.totalorder %s430_s26, %s646_s9  ;;  %p651_p5 = scmp.lt.s32.totalorder %s430_s26, %s430_s26 }
 0x2ef   :  { %p652_p6 = scmp.lt.s32.totalorder %s646_s9, %s646_s9 }
 0x2f1   :  { %p653_p7 = por %p652_p6, %p651_p5 }
 0x2f3   :  { %p654_p8 = pnand %p653_p7, %p647_p4 }
 0x352   :  { %v406_v61 = vpop.permute.xlu0 %405  ;;  %v392_v62 = vpop.permute.xlu1 %391 }
 0x353   :  { %395 = vst.msk [vmem:[#allocation9] sm:$0xff] %vm394_vm2, %v392_v62  ;;  %408 = vst.msk [vmem:[#allocation12] sm:$0xff] %vm394_vm2, %v406_v61 }
 0x354   :  { %657 = shalt.err (!%p654_p8)
}
 0x355   :  { %s658_s6 = scalar_lea.hbm %s995_s10, 128 }
 0x356   :  { %p659_p9 = scmp.ne.s32.totalorder %s995_s10, %s658_s6  ;;  %p662_p10 = scmp.lt.u32.totalorder %s658_s6, %s995_s10 }
 0x358   :  { %p664_p11 = pnand %p662_p10, %p659_p9 }
 0x35a   :  { %667 = shalt.err (!%p664_p11)
}
 0x35b   :  { %432 = dma.vmem_to_hbm [thread:$0]  %s430_s26, 128, %s995_s10, [#allocation10]  }
 0x35c   :  { %s668_s5 = scalar_lea.vmem %s926_s27, 128  ;;  %p673_p13 = scmp.lt.s32.totalorder %s926_s27, %s926_s27 }
 0x35d   :  { %p669_p12 = scmp.ne.s32.totalorder %s926_s27, %s668_s5  ;;  %p674_p0 = scmp.lt.s32.totalorder %s668_s5, %s668_s5 }
 0x35f   :  { %p675_p1 = por %p674_p0, %p673_p13 }
 0x361   :  { %p676_p2 = pnand %p675_p1, %p669_p12 }
 0x363   :  { %679 = shalt.err (!%p676_p2)
}
 0x364   :  { %s680_s1 = scalar_lea.hbm %s998_s13, 128 }
 0x365   :  { %p681_p3 = scmp.ne.s32.totalorder %s998_s13, %s680_s1  ;;  %p684_p4 = scmp.lt.u32.totalorder %s680_s1, %s998_s13 }
 0x367   :  { %p686_p5 = pnand %p684_p4, %p681_p3 }
 0x369   :  { %689 = shalt.err (!%p686_p5)
}
 0x36a   :  { %454 = dma.vmem_to_hbm [thread:$0]  %s926_s27, 128, %s998_s13, [#allocation13]   ;;  %v410_v63 = vpop.permute.xlu0 %409  ;;  %v402_v0 = vpop.permute.xlu1 %401 }
 0x36b   :  { %412 = vst.msk [vmem:[%s999_s14] sm:$0xff] %vm399_vm3, %v410_v63  ;;  %s690_s26 = scalar_lea.vmem %s928_s16, 128  ;;  %p695_p7 = scmp.lt.s32.totalorder %s928_s16, %s928_s16 }
 0x36c   :  { %404 = vst.msk [vmem:[#allocation11] sm:$0xff] %vm92_vm1, %v402_v0  ;;  %p691_p6 = scmp.ne.s32.totalorder %s928_s16, %s690_s26  ;;  %p696_p8 = scmp.lt.s32.totalorder %s690_s26, %s690_s26 }
 0x36e   :  { %p697_p9 = por %p696_p8, %p695_p7 }
 0x370   :  { %p698_p10 = pnand %p697_p9, %p691_p6 }
 0x372   :  { %701 = shalt.err (!%p698_p10)
}
 0x373   :  { %s702_s13 = scalar_lea.hbm %s997_s12, 128 }
 0x374   :  { %p703_p11 = scmp.ne.s32.totalorder %s997_s12, %s702_s13  ;;  %p706_p12 = scmp.lt.u32.totalorder %s702_s13, %s997_s12 }
 0x376   :  { %p708_p13 = pnand %p706_p12, %p703_p11 }
 0x378   :  { %711 = shalt.err (!%p708_p13)
}
 0x379   :  { %444 = dma.vmem_to_hbm [thread:$0]  %s928_s16, 128, %s997_s12, [#allocation10]   ;;  %v397_v1 = vpop.permute.xlu1 %396 }
 0x37a   :  { %400 = vst.msk [vmem:[%s996_s11] sm:$0xff] %vm399_vm3, %v397_v1 }
 0x37b   :  { %716 = dma.done.wait [#allocation4], 128  }
 0x37c   :  { %717 = vsyncadd [#allocation4], 4294967168 }
 0x37d   :  { %718 = dma.done.wait [#allocation10], 256  }
 0x37e   :  { %719 = vsyncadd [#allocation10], 4294967040 }
 0x37f   :  { %720 = dma.done.wait [#allocation13], 128  }
 0x380   :  { %721 = vsyncadd [#allocation13], 4294967168 }
 0x381   :  { %473 = vsyncpa [#allocation3], 1 }
 0x382   :  { %474 = vsyncpa [#allocation6], 1 }
 0x383   :  { %475 = vsyncpa [#allocation4], 1 }
 0x384   :  { %476 = vsyncpa [#allocation10], 1 }
 0x385   :  { %477 = vsyncpa [#allocation13], 1 }

</bundles_post_ra>
